<compile_context>
chip_gen: v6e
topology: v6e:2x2x1
jax: 0.10.0
libtpu: 0.0.40
codegen_flags: <defaults>
</compile_context>

<pallas_src>
import functools

import jax
import jax.numpy as jnp
from jax import lax
from jax.experimental import pallas as pl
from jax.experimental.pallas import tpu as pltpu

# ----------------------------- config (synthetic CFG) -----------------------------
NUM_CLASSES = 16          # CFG.num_classes
EMBED_DIM = 32            # cfg.encoder_embed_dim
SEQ_LEN = 24              # number of BEATs output frames (toy)
BATCH = 2
USE_BCE = True            # CFG.loss == 'BCE'  -> apply sigmoid

_LANE = 128               # lane width
_FEATS_TILE_BYTES = 8 * 1024 * 1024   # per-buffer feats tile budget (VMEM headroom)


# ----------------------------- Pallas kernel -----------------------------
def _head_kernel(x_ref, w_ref, b_ref, o_ref, acc_ref, *,
                 apply_sigmoid: bool, inv_t: float, t_total: int, need_t_mask: bool):
    """One (batch-tile, time-tile) grid step.

    x_ref:   (TB, TT, D)   feature tile (compute dtype, e.g. bf16)
    w_ref:   (D,  Cp)      fc weight (compute dtype), resident across the T axis
    b_ref:   (1,  Cp)      fc bias (f32), resident across the T axis
    o_ref:   (TB, Cp)      output tile, written only at the last T step
    acc_ref: (TB, D)       f32 running sum over T (VMEM scratch)
    """
    t = pl.program_id(1)

    @pl.when(t == 0)
    def _init():
        acc_ref[...] = jnp.zeros_like(acc_ref)

    # Partial T-sum in f32 (accumulation never happens in bf16).
    x = x_ref[...].astype(jnp.float32)                               # (TB, TT, D)
    if need_t_mask:
        tt = x.shape[1]
        row = t * tt + lax.broadcasted_iota(jnp.int32, (1, tt, 1), 1)
        x = jnp.where(row < t_total, x, 0.0)                          # zero OOB rows
    acc_ref[...] += jnp.sum(x, axis=1)                                # (TB, D)

    @pl.when(t == pl.num_programs(1) - 1)
    def _finalize():
        pooled = acc_ref[...] * inv_t                                 # (TB, D) f32 mean
        logits = jnp.dot(pooled.astype(w_ref.dtype), w_ref[...],
                         preferred_element_type=jnp.float32)          # (TB, Cp) f32
        logits = logits + b_ref[...]                                  # f32 bias
        if apply_sigmoid:
            logits = jax.nn.sigmoid(logits)
        o_ref[...] = logits.astype(o_ref.dtype)                       # lane-dense store


def _pick_time_tile(T: int, tb: int, D: int, itemsize: int, budget_bytes: int) -> int:
    """Largest sublane-aligned T tile whose feats block fits the per-buffer budget."""
    sub = 16 if itemsize < 4 else 8            # bf16 packs 16 rows / vreg, f32 packs 8
    max_rows = max(sub, budget_bytes // max(1, tb * D * itemsize))
    tt = (max_rows // sub) * sub
    if tt >= T:
        return T                               # full extent: always layout-legal
    return max(tt, sub)


def bird_head(feats: jax.Array, w: jax.Array, b: jax.Array, *,
              apply_sigmoid: bool = USE_BCE,
              compute_dtype=jnp.bfloat16,
              tb: int | None = None,
              tt: int | None = None,
              feats_tile_bytes: int = _FEATS_TILE_BYTES) -> jax.Array:
    """feats: (B, T, D), w: (D, C), b: (C,) -> (B, C) f32."""
    B, T, D = feats.shape
    assert w.shape[0] == D
    C = w.shape[1]

    # Lane-dense class dim (pad to a multiple of 128; real bird class counts ~200).
    c_pad = max(_LANE, ((C + _LANE - 1) // _LANE) * _LANE)

    # Boundary casts: bf16 halves the HBM bytes of the mem-bound feats read and is the
    # native MXU input dtype; bias and all accumulation stay f32.
    feats_c = feats.astype(compute_dtype)
    w_c = jnp.pad(w, ((0, 0), (0, c_pad - C))).astype(compute_dtype)
    b_c = jnp.pad(b, (0, c_pad - C)).astype(jnp.float32).reshape(1, c_pad)

    itemsize = jnp.dtype(compute_dtype).itemsize
    if tb is None:
        tb = B if B <= 8 else 8
    if tt is None:
        tt = _pick_time_tile(T, tb, D, itemsize, feats_tile_bytes)
    need_t_mask = (T % tt) != 0

    grid = (pl.cdiv(B, tb), pl.cdiv(T, tt))

    kernel = functools.partial(
        _head_kernel,
        apply_sigmoid=apply_sigmoid,
        inv_t=1.0 / float(T),
        t_total=T,
        need_t_mask=need_t_mask,
    )

    cost = pl.CostEstimate(
        flops=B * T * D + 2 * B * D * c_pad,                 # T-sum + matmul
        transcendentals=(B * c_pad) if apply_sigmoid else 0,  # sigmoid (EUP)
        bytes_accessed=(feats_c.size * itemsize + w_c.size * itemsize
                        + b_c.size * 4 + B * c_pad * 4),
    )

    out = pl.pallas_call(
        kernel,
        out_shape=jax.ShapeDtypeStruct((B, c_pad), jnp.float32),
        grid=grid,
        in_specs=[
            pl.BlockSpec((tb, tt, D), lambda bi, ti: (bi, ti, 0)),   # feats tile
            pl.BlockSpec((D, c_pad), lambda bi, ti: (0, 0)),         # weight, resident
            pl.BlockSpec((1, c_pad), lambda bi, ti: (0, 0)),         # bias, resident
        ],
        out_specs=pl.BlockSpec((tb, c_pad), lambda bi, ti: (bi, 0)), # written at last t
        scratch_shapes=[pltpu.VMEM((tb, D), jnp.float32)],           # f32 T-sum
        compiler_params=pltpu.CompilerParams(
            dimension_semantics=("parallel", "arbitrary")),
        cost_estimate=cost,
    )(feats_c, w_c, b_c)

    return out[:, :C]


# ----------------------------- reference (plain JAX) -----------------------------
def bird_head_ref(feats, w, b, apply_sigmoid=USE_BCE):
    y = jnp.einsum("btd,dc->btc", feats, w) + b[None, None, :]
    y = y.mean(axis=1)
    return jax.nn.sigmoid(y) if apply_sigmoid else y


# ----------------------------- main -----------------------------
if __name__ == "__main__":
    key = jax.random.PRNGKey(0)
    k_x, k_w, k_b = jax.random.split(key, 3)

    # Synthetic "extracted features" standing in for BEATs.extract_features output.
    feats = jax.random.normal(k_x, (BATCH, SEQ_LEN, EMBED_DIM), dtype=jnp.float32)

    # Deterministic fc parameters: Linear(EMBED_DIM -> NUM_CLASSES).
    w = (jax.random.normal(k_w, (EMBED_DIM, NUM_CLASSES), dtype=jnp.float32)
         / jnp.sqrt(jnp.float32(EMBED_DIM)))
    b = jax.random.normal(k_b, (NUM_CLASSES,), dtype=jnp.float32) * 0.01

    ref = bird_head_ref(feats, w, b)

    # 1) Production-style path: bf16 DMA/MXU dtype, auto tiling (single tile at toy size).
    out_bf16 = jax.block_until_ready(bird_head(feats, w, b, compute_dtype=jnp.bfloat16))
    assert out_bf16.shape == (BATCH, NUM_CLASSES), out_bf16.shape
    assert jnp.allclose(out_bf16, ref, atol=2e-2, rtol=2e-2), "bf16 path mismatch"

    # 2) Forced multi-step T reduction (grid over T) with a masked partial last tile.
    out_tiled = jax.block_until_ready(
        bird_head(feats, w, b, compute_dtype=jnp.bfloat16, tt=16))
    assert jnp.allclose(out_tiled, ref, atol=2e-2, rtol=2e-2), "tiled bf16 mismatch"

    # 3) f32 path (tight tolerance) through the same tiled accumulator code path.
    out_f32 = jax.block_until_ready(
        bird_head(feats, w, b, compute_dtype=jnp.float32, tt=16))
    assert jnp.allclose(out_f32, ref, atol=1e-4, rtol=1e-4), "f32 path mismatch"

    print("KERNEL_OK")
</pallas_src>

<mosaic_0001>
module attributes {stable_mosaic.version = 11 : i64} {
  func.func @_head_kernel(%arg0: i32, %arg1: i32, %arg2: memref<2x24x32xbf16, #tpu.memory_space<vmem>>, %arg3: memref<32x128xbf16, #tpu.memory_space<vmem>>, %arg4: memref<1x128xf32, #tpu.memory_space<vmem>>, %arg5: memref<2x128xf32, #tpu.memory_space<vmem>>, %arg6: memref<2x32xf32, #tpu.memory_space<vmem>>) attributes {dimension_semantics = [#tpu.dimension_semantics<parallel>, #tpu.dimension_semantics<arbitrary>], iteration_bounds = array<i64: 1, 1>, scalar_prefetch = 0 : i64, scratch_operands = 1 : i64, tpu.core_type = #tpu.core_type<tc>, window_params = [{transform_indices = @transform_0, window_bounds = array<i64: 2, 24, 32>}, {pipeline_mode = #tpu.pipeline_mode<synchronous>, transform_indices = @transform_1, window_bounds = array<i64: 32, 128>}, {pipeline_mode = #tpu.pipeline_mode<synchronous>, transform_indices = @transform_2, window_bounds = array<i64: 1, 128>}, {transform_indices = @transform_3, window_bounds = array<i64: 2, 128>}]} {
    %c0_i32 = arith.constant 0 : i32
    %0 = arith.cmpi eq, %arg1, %c0_i32 : i32
    %1 = arith.extui %0 : i1 to i32
    %c0_i32_0 = arith.constant 0 : i32
    %2 = arith.cmpi ne, %1, %c0_i32_0 : i32
    scf.if %2 {
      %cst_9 = arith.constant 0.000000e+00 : f32
      %12 = vector.broadcast %cst_9 : f32 to vector<2x32xf32>
      %c0_10 = arith.constant 0 : index
      %c0_11 = arith.constant 0 : index
      %13 = vector.load %arg6[%c0_10, %c0_11] : memref<2x32xf32, #tpu.memory_space<vmem>>, vector<2x32xf32>
      tpu.vector_store %arg6[%c0_10, %c0_11], %12 {strides = array<i32>} : memref<2x32xf32, #tpu.memory_space<vmem>>, vector<2x32xf32>,
    } else {
    }
    %c0 = arith.constant 0 : index
    %c0_1 = arith.constant 0 : index
    %c0_2 = arith.constant 0 : index
    %3 = vector.load %arg2[%c0, %c0_1, %c0_2] : memref<2x24x32xbf16, #tpu.memory_space<vmem>>, vector<2x24x32xbf16>
    %4 = arith.extf %3 : vector<2x24x32xbf16> to vector<2x24x32xf32>
    %c0_3 = arith.constant 0 : index
    %c0_4 = arith.constant 0 : index
    %5 = vector.load %arg6[%c0_3, %c0_4] : memref<2x32xf32, #tpu.memory_space<vmem>>, vector<2x32xf32>
    %cst = arith.constant dense<0.000000e+00> : vector<2x32xf32>
    %6 = vector.multi_reduction <add>, %4, %cst [1] : vector<2x24x32xf32> to vector<2x32xf32>
    %7 = arith.addf %5, %6 : vector<2x32xf32>
    %c0_5 = arith.constant 0 : index
    %c0_6 = arith.constant 0 : index
    %8 = vector.load %arg6[%c0_5, %c0_6] : memref<2x32xf32, #tpu.memory_space<vmem>>, vector<2x32xf32>
    tpu.vector_store %arg6[%c0_5, %c0_6], %7 {strides = array<i32>} : memref<2x32xf32, #tpu.memory_space<vmem>>, vector<2x32xf32>,
    %c0_i32_7 = arith.constant 0 : i32
    %9 = arith.cmpi eq, %arg1, %c0_i32_7 : i32
    %10 = arith.extui %9 : i1 to i32
    %c0_i32_8 = arith.constant 0 : i32
    %11 = arith.cmpi ne, %10, %c0_i32_8 : i32
    scf.if %11 {
      %c0_9 = arith.constant 0 : index
      %c0_10 = arith.constant 0 : index
      %12 = vector.load %arg6[%c0_9, %c0_10] : memref<2x32xf32, #tpu.memory_space<vmem>>, vector<2x32xf32>
      %cst_11 = arith.constant 0.0416666679 : f32
      %13 = vector.broadcast %cst_11 : f32 to vector<2x32xf32>
      %14 = arith.mulf %12, %13 : vector<2x32xf32>
      %15 = arith.truncf %14 : vector<2x32xf32> to vector<2x32xbf16>
      %c0_12 = arith.constant 0 : index
      %c0_13 = arith.constant 0 : index
      %16 = vector.load %arg3[%c0_12, %c0_13] : memref<32x128xbf16, #tpu.memory_space<vmem>>, vector<32x128xbf16>
      %cst_14 = arith.constant dense<0.000000e+00> : vector<2x128xf32>
      %17 = tpu.matmul %15, %16, %cst_14 {dimension_numbers = #tpu.dot_dimension_numbers<[1], [0], [0], [1], [0, 0, 1, 1], [], []>} : vector<2x32xbf16>, vector<32x128xbf16>, vector<2x128xf32> -> vector<2x128xf32>
      %c0_15 = arith.constant 0 : index
      %c0_16 = arith.constant 0 : index
      %18 = vector.load %arg4[%c0_15, %c0_16] : memref<1x128xf32, #tpu.memory_space<vmem>>, vector<1x128xf32>
      %19 = vector.broadcast %18 : vector<1x128xf32> to vector<2x128xf32>
      %20 = arith.addf %17, %19 : vector<2x128xf32>
      %21 = arith.negf %20 : vector<2x128xf32>
      %22 = math.exp %21 : vector<2x128xf32>
      %cst_17 = arith.constant 1.000000e+00 : f32
      %23 = vector.broadcast %cst_17 : f32 to vector<2x128xf32>
      %24 = arith.addf %23, %22 : vector<2x128xf32>
      %25 = arith.divf %23, %24 : vector<2x128xf32>
      %c0_18 = arith.constant 0 : index
      %c0_19 = arith.constant 0 : index
      %26 = vector.load %arg5[%c0_18, %c0_19] : memref<2x128xf32, #tpu.memory_space<vmem>>, vector<2x128xf32>
      tpu.vector_store %arg5[%c0_18, %c0_19], %25 {strides = array<i32>} : memref<2x128xf32, #tpu.memory_space<vmem>>, vector<2x128xf32>,
    } else {
    }
    return
  }
  func.func @transform_0(%arg0: i32, %arg1: i32) -> (i32, i32, i32) {
    %c0_i32 = arith.constant 0 : i32
    %c0_i32_0 = arith.constant 0 : i32
    return %arg0, %arg1, %c0_i32 : i32, i32, i32
  }
  func.func @transform_1(%arg0: i32, %arg1: i32) -> (i32, i32) {
    %c0_i32 = arith.constant 0 : i32
    %c0_i32_0 = arith.constant 0 : i32
    %c0_i32_1 = arith.constant 0 : i32
    return %c0_i32, %c0_i32_0 : i32, i32
  }
  func.func @transform_2(%arg0: i32, %arg1: i32) -> (i32, i32) {
    %c0_i32 = arith.constant 0 : i32
    %c0_i32_0 = arith.constant 0 : i32
    %c0_i32_1 = arith.constant 0 : i32
    return %c0_i32, %c0_i32_0 : i32, i32
  }
  func.func @transform_3(%arg0: i32, %arg1: i32) -> (i32, i32) {
    %c0_i32 = arith.constant 0 : i32
    %c0_i32_0 = arith.constant 0 : i32
    return %arg0, %c0_i32 : i32, i32
  }
}

</mosaic_0001>

<bundles_post_ra>
// kernel: tpu_custom_call.1
= control target key start
LH: loop header
LB: loop body
LE: loop exit
PB: predicated region body
PF: predicated region fallthrough
CT: control target
= control target key end

     0   :  { %8 = vsyncpa [#allocation4], 0  ;;  %s346_s0 = inlined_call_operand.hbm [shape: bf16[2,24,32], index: 0, kind: input, shape index: {}]   ;;  %s347_s1 = inlined_call_operand.hbm [shape: bf16[32,128], index: 1, kind: input, shape index: {}]   ;;  %s348_s2 = inlined_call_operand.vmem [shape: f32[1,128], index: 2, kind: input, shape index: {}]   ;;  %s349_s3 = inlined_call_operand.hbm [shape: f32[2,128], index: 3, kind: output, shape index: {}]  }
   0x1   :  { %9 = vsyncpa [#allocation7], 0 }
   0x2   :  { %10 = vsyncpa [#allocation5], 0  ;;  %s298_s12 = smov [#allocation3]  }
   0x3   :  { %s16_s13 = sshll.u32 %s298_s12, 4  ;;  %s17_s13 = int_to_ptr.vmem [resolvable:$true] %s16_s13 }
   0x4   :  { %s240_s14 = scalar_lea.vmem %s17_s13, 384  ;;  %p245_p1 = scmp.lt.s32.totalorder %s17_s13, %s17_s13 }
   0x5   :  { %p241_p0 = scmp.ne.s32.totalorder %s17_s13, %s240_s14  ;;  %p246_p2 = scmp.lt.s32.totalorder %s240_s14, %s240_s14 }
   0x7   :  { %p247_p3 = por %p246_p2, %p245_p1 }
   0x9   :  { %p248_p4 = pnand %p247_p3, %p241_p0 }
   0xb   :  { %251 = shalt.err (!%p248_p4)
}
   0xc   :  { %s299_s15 = smov 64   ;;  %s300_s16 = smov 4  }
   0xd   :  { %22 = dma.hbm_to_vmem [thread:$0]  %s346_s0, 384, %s17_s13, [#allocation4], %s299_s15, %s299_s15, %s300_s16  }
   0xe   :  { %s301_s19 = smov [#allocation6]  }
   0xf   :  { %s28_s20 = sshll.u32 %s301_s19, 4  ;;  %s29_s20 = int_to_ptr.vmem [resolvable:$true] %s28_s20 }
  0x10   :  { %s260_s21 = scalar_lea.vmem %s29_s20, 256  ;;  %p265_p6 = scmp.lt.s32.totalorder %s29_s20, %s29_s20 }
  0x11   :  { %p261_p5 = scmp.ne.s32.totalorder %s29_s20, %s260_s21  ;;  %p266_p7 = scmp.lt.s32.totalorder %s260_s21, %s260_s21 }
  0x13   :  { %p267_p8 = por %p266_p7, %p265_p6 }
  0x15   :  { %p268_p9 = pnand %p267_p8, %p261_p5 }
  0x17   :  { %271 = shalt.err (!%p268_p9)
}
  0x18   :  { %34 = dma.hbm_to_vmem [thread:$0]  %s347_s1, 256, %s29_s20, [#allocation7], %s299_s15, %s299_s15, %s300_s16  }
  0x19   :  { %292 = dma.done.wait [#allocation4], 384  }
  0x1a   :  { %293 = vsyncadd [#allocation4], 4294966912 }
  0x1b   :  { %294 = dma.done.wait [#allocation7], 256  }
  0x1c   :  { %295 = vsyncadd [#allocation7], 4294967040  ;;  %vm48_vm0 = vcmask 254976   ;;  %v302_v0 = vmov 0.0   ;;  %vm303_vm1 = vmmov 0   ;;  %v226_v1 = vld [vmem:[#allocation6 + $0x8] sm:$0xff]  }
  0x1d   :  { %49 = vst.msk [vmem:[#allocation2] sm:$0x3] %vm48_vm0, %v302_v0  ;;  %211 = vmatprep.subr.bf16.mxu0 %v302_v0  ;;  %215 = vmatprep.mubr.msk.bf16.mxu0 %vm303_vm1, %v302_v0  ;;  %v227_v2 = vld [vmem:[#allocation6] sm:$0xff]   ;;  %v195_v3 = vld [vmem:[#allocation3] sm:$0xff]   ;;  %v206_v4 = vld [vmem:[#allocation3 + $0x8] sm:$0xff]   ;;  %vm63_vm2 = vcmask 261120  }
  0x1e   :  { %212 = vmatpush3.bf16.msra.mxu0 %v226_v1  ;;  %v207_v5 = vld [vmem:[#allocation3 + $0x10] sm:$0xff]   ;;  %v196_v6 = vunpack.c.l.bf16 %v195_v3  ;;  %v197_v7 = vunpack.c.h.bf16 %v195_v3  ;;  %v200_v8 = vunpack.c.l.bf16 %v206_v4  ;;  %v201_v9 = vunpack.c.h.bf16 %v206_v4  ;;  %v189_v40 = vld [vmem:[%s348_s2] ss:$0 sm:$0xff]  ;;  %s304_s24 = smov [#allocation8]  }
  0x1f   :  { %213 = vmatprep.subr.bf16.mxu0 %v302_v0  ;;  %v204_v10 = vunpack.c.l.bf16 %v207_v5  ;;  %v205_v11 = vunpack.c.h.bf16 %v207_v5  ;;  %vm88_vm3 = vcmask 1041409   ;;  %s179_s25 = sshll.u32 %s304_s24, 4  ;;  %s180_s25 = int_to_ptr.vmem [resolvable:$true] %s179_s25 }
  0x20   :  { %v64_v12 = vsel %vm63_vm2, %v196_v6, 0.0  ;;  %v65_v13 = vsel %vm63_vm2, %v197_v7, 0.0  ;;  %v67_v14 = vsel %vm63_vm2, %v200_v8, 0.0  ;;  %v75_v15 = vsel %vm63_vm2, %v201_v9, 0.0  ;;  %s272_s26 = scalar_lea.vmem %s180_s25, 32  ;;  %p277_p11 = scmp.lt.s32.totalorder %s180_s25, %s180_s25 }
  0x21   :  { %v66_v16 = vadd.f32 %v65_v13, %v64_v12  ;;  %v76_v17 = vsel %vm63_vm2, %v204_v10, 0.0  ;;  %v78_v18 = vsel %vm63_vm2, %v205_v11, 0.0  ;;  %p273_p10 = scmp.ne.s32.totalorder %s180_s25, %s272_s26  ;;  %p278_p12 = scmp.lt.s32.totalorder %s272_s26, %s272_s26 }
  0x22   :  { %214 = vmatpush3.bf16.msra.mxu0 %v227_v2  ;;  %v77_v19 = vadd.f32 %v76_v17, %v75_v15 }
  0x23   :  { %v68_v20 = vadd.f32 %v67_v14, %v66_v16  ;;  %p279_p13 = por %p278_p12, %p277_p11 }
  0x24   :  { %v79_v21 = vadd.f32 %v78_v18, %v77_v19  ;;  %v62_v33 = vld [vmem:[#allocation2] sm:$0x3] }
  0x25   :  { %v69_v22 = vrot.slane %v68_v20, 4  ;;  %p280_p0 = pnand %p279_p13, %p273_p10 }
  0x26   :  { %v80_v23 = vrot.slane %v79_v21, 4 }
  0x27   :  { %v70_v24 = vadd.f32 %v69_v22, %v68_v20 }
  0x28   :  { %v81_v25 = vadd.f32 %v80_v23, %v79_v21 }
  0x29   :  { %v71_v26 = vrot.slane %v70_v24, 2 }
  0x2a   :  { %v82_v27 = vrot.slane %v81_v25, 2 }
  0x2b   :  { %v72_v28 = vadd.f32 %v71_v26, %v70_v24 }
  0x2c   :  { %v83_v29 = vadd.f32 %v82_v27, %v81_v25 }
  0x2d   :  { %v73_v30 = vrot.slane %v72_v28, 1 }
  0x2e   :  { %v84_v31 = vrot.slane %v83_v29, 1 }
  0x2f   :  { %v74_v32 = vadd.f32 %v73_v30, %v72_v28 }
  0x30   :  { %v85_v34 = vadd.f32 %v84_v31, %v83_v29 }
  0x32   :  { %v89_v35 = vsel %vm88_vm3, %v85_v34, %v74_v32 }
  0x33   :  { %v91_v36 = vadd.f32 %v89_v35, %v62_v33 }
  0x35   :  { %93 = vst.msk [vmem:[#allocation2] sm:$0x3] %vm48_vm0, %v91_v36 }
  0x3c   :  { %v97_v37 = vld [vmem:[#allocation2] sm:$0x3] }
  0x3d   :  { %v98_v38 = vmul.f32 0.041666668, %v97_v37 }
  0x3f   :  { %v99_v39 = vpack.c.bf16 %v98_v38, %v98_v38 }
  0x41   :  { %216 = vmatmul.mubr.msk.bf16.vlgmr.msra.gmra.mxu0 %vm63_vm2, %v99_v39 }
 0x101   :  { %v160_v41 = vpop.f32.mrf.mxu0 }
 0x102   :  { %v161_v42 = vadd.f32 %v189_v40, %v160_v41 }
 0x103   :  { %v217_v43 = vpop.f32.mrf.mxu0 }
 0x104   :  { %v193_v44 = vmul.f32 -1.442695, %v161_v42 }
 0x105   :  { %v163_v45 = vpop.f32.mrf.mxu0 }
 0x106   :  { %228 = vpow2.f32 %v193_v44 }
 0x107   :  { %v218_v46 = vpop.f32.mrf.mxu0 }
 0x113   :  { %v229_v47 = vpop.eup %228 }
 0x114   :  { %v169_v48 = vadd.f32 1.0, %v229_v47 }
 0x116   :  { %230 = vrcp.f32 %v169_v48 }
 0x123   :  { %v231_v49 = vpop.eup %230 }
 0x124   :  { %172 = vst [vmem:[#allocation8] sm:$0x3] %v231_v49 }
 0x125   :  { %283 = shalt.err (!%p280_p0)
}
 0x126   :  { %182 = dma.vmem_to_hbm [thread:$0]  %s180_s25, 32, %s349_s3, [#allocation5]  }
 0x127   :  { %296 = dma.done.wait [#allocation5], 32  }
 0x128   :  { %297 = vsyncadd [#allocation5], 4294967264 }
 0x129   :  { %186 = vsyncpa [#allocation4], 1 }
 0x12a   :  { %187 = vsyncpa [#allocation7], 1 }
 0x12b   :  { %188 = vsyncpa [#allocation5], 1 }

</bundles_post_ra>
